<compile_context>
chip_gen: v7x
topology: tpu7x:2x2x1
jax: 0.10.0
libtpu: 0.0.40
codegen_flags: <defaults>
</compile_context>

<pallas_src>
import functools

import jax
import jax.numpy as jnp
from jax.experimental import pallas as pl
from jax.experimental.pallas import tpu as pltpu


def _round_up(x: int, m: int) -> int:
    return ((x + m - 1) // m) * m


def _num_tensorcores_per_chip() -> int:
    # v7x has 2 TensorCores per chip that ("parallel",) grid axes shard across;
    # v5e / v6e have 1.  Best-effort string detection; default to 1.
    try:
        kind = jax.devices()[0].device_kind.lower()
        if "v7" in kind or "7x" in kind:
            return 2
    except Exception:
        pass
    return 1


_N_CORES = _num_tensorcores_per_chip()
_BT_CAP = 1024  # batch-tile cap (multiple of 8); a 1024x128 f32 tile is only 0.5 MiB


def _fused_mlp_kernel(x_ref, *refs, num_layers: int):
    """Fused multi-layer  x @ W + b  with leaky_relu between layers.

    refs = (w_0, b_0, ..., w_{L-1}, b_{L-1}, out_ref, act_scratch).
    Weights/biases are VMEM-resident full blocks (constant index_map), feature
    dims padded to 128 except the very first K dim (== x's true width, so x
    never needs column padding).  The inter-layer activation is staged through
    a VMEM scratch ref to bound vreg pressure at large batch tiles.
    """
    o_ref = refs[2 * num_layers]
    act_ref = refs[2 * num_layers + 1]
    wb = refs[: 2 * num_layers]

    lhs = x_ref[...]
    rows = lhs.shape[0]
    for i in range(num_layers):
        w = wb[2 * i][...]          # (K, F_out_pad)
        b = wb[2 * i + 1][...]      # (1, F_out_pad) — broadcasts over batch
        z = jnp.dot(lhs.astype(w.dtype), w,
                    preferred_element_type=jnp.float32) + b
        if i < num_layers - 1:
            width = z.shape[1]
            # leaky_relu, default negative_slope=0.01 (matches F.leaky_relu);
            # stage through VMEM scratch so h is not held live in vregs.
            act_ref[0:rows, 0:width] = jnp.where(z >= 0.0, z, 0.01 * z)
            lhs = act_ref[0:rows, 0:width]
        else:
            if z.shape[1] != o_ref.shape[1]:
                # Small-batch path: write only the true output columns
                # (one masked vst of a tiny tile, no separate slice op).
                z = z[:, : o_ref.shape[1]]
            o_ref[...] = z.astype(o_ref.dtype)


def prepare_params(params, weight_dtype=jnp.float32):
    """Pre-transpose + zero-pad PyTorch-layout params once (outside the kernel).

    params: list of (w [F_out, F_in], b [F_out]) float32 arrays.
    Layer 0's K dim is kept at the true input width (so x needs no column
    padding); all other feature dims are padded to multiples of 128 so every
    matmul operand and intermediate store is lane-dense.  Padding is exact:
    padded rows/cols and bias entries are zero and leaky_relu(0) == 0.
    weight_dtype=jnp.bfloat16 halves weight DMA/VMEM and MXU passes for wide
    layers, but loosens numerics vs the f32 PyTorch reference.
    """
    flat = []
    for li, (w, b) in enumerate(params):
        f_out, f_in = w.shape
        in_p = f_in if li == 0 else _round_up(f_in, 128)
        out_p = _round_up(f_out, 128)
        w_t = jnp.zeros((in_p, out_p), weight_dtype).at[:f_in, :f_out].set(
            w.T.astype(weight_dtype))
        b_p = jnp.zeros((1, out_p), jnp.float32).at[0, :f_out].set(b)
        flat.extend([w_t, b_p])
    return tuple(flat)


@functools.partial(jax.jit, static_argnums=(2, 3))
def mlp_forward_pallas(x, padded_flat, out_features, bt_override=None):
    """Fused-MLP forward.  x: (B, F_in) float32; returns (B, out_features)."""
    num_layers = len(padded_flat) // 2
    B, f_in = x.shape
    out_p = padded_flat[-1].shape[1]
    inter_widths = [padded_flat[2 * i + 1].shape[1] for i in range(num_layers - 1)]
    act_w = max(inter_widths) if inter_widths else 128

    # ---- batch-tile selection --------------------------------------------
    b8 = _round_up(B, 8)
    if bt_override is not None:
        bt = _round_up(min(int(bt_override), b8), 8)
    elif _N_CORES > 1 and b8 >= 16:
        # Megacore-aware: at least 2 grid steps so ("parallel",) can shard the
        # batch across both TensorCores on v7x.
        bt = min(_BT_CAP, _round_up(-(-b8 // _N_CORES), 8))
    else:
        bt = min(_BT_CAP, b8)
    grid_b = -(-b8 // bt)
    b_pad = grid_b * bt
    small = grid_b == 1

    kernel = functools.partial(_fused_mlp_kernel, num_layers=num_layers)
    w_specs = [pl.BlockSpec(p.shape, lambda i: (0, 0)) for p in padded_flat]

    # VMEM budget: double-buffered in/out tiles + resident params + scratch,
    # with headroom.  Setting it explicitly raises v5e's 16 MiB default scoped
    # limit; clamp well below v7x's 64 MiB physical VMEM.
    tile_rows = B if small else bt
    out_cols = out_features if small else out_p
    needed = 2 * tile_rows * f_in * 4 + 2 * tile_rows * out_cols * 4
    needed += sum(2 * int(p.size) * p.dtype.itemsize for p in padded_flat)
    needed += _round_up(tile_rows, 8) * act_w * 4
    vmem_limit = min(max(int(needed * 1.5) + (2 << 20), 32 << 20), 60 << 20)
    # TODO(synk): if hidden widths grow past what fits in v7x's 64 MiB VMEM,
    # fall back to tiling weights over K/N with pltpu.emit_pipeline.

    cparams = pltpu.CompilerParams(
        dimension_semantics=("parallel",), vmem_limit_bytes=vmem_limit)

    if small:
        # Latency path (e.g. B=8): single grid step, no wrapper-side pad of x
        # and no trailing slice — the kernel emits the true output shape
        # directly (full-extent blocks are legal for any dims).
        return pl.pallas_call(
            kernel,
            out_shape=jax.ShapeDtypeStruct((B, out_features), x.dtype),
            grid=(1,),
            in_specs=[pl.BlockSpec((B, f_in), lambda i: (0, 0))] + w_specs,
            out_specs=pl.BlockSpec((B, out_features), lambda i: (0, 0)),
            scratch_shapes=[pltpu.VMEM((_round_up(B, 8), act_w), jnp.float32)],
            compiler_params=cparams,
        )(x, *padded_flat)

    # Throughput path: pad batch to a multiple of the tile; keep the output
    # lane-dense (padded to 128) so stores are unmasked; slice once at the end.
    x_p = x if b_pad == B else jnp.zeros((b_pad, f_in), x.dtype).at[:B].set(x)
    out_padded = pl.pallas_call(
        kernel,
        out_shape=jax.ShapeDtypeStruct((b_pad, out_p), x.dtype),
        grid=(grid_b,),
        in_specs=[pl.BlockSpec((bt, f_in), lambda i: (i, 0))] + w_specs,
        out_specs=pl.BlockSpec((bt, out_p), lambda i: (i, 0)),
        scratch_shapes=[pltpu.VMEM((bt, act_w), jnp.float32)],
        compiler_params=cparams,
    )(x_p, *padded_flat)
    return out_padded[:B, :out_features]


def init_params(shape, key):
    """Deterministic init mimicking nn.Linear's U(-1/sqrt(fan_in), 1/sqrt(fan_in))."""
    params = []
    for ins, outs in zip(shape[:-1], shape[1:]):
        key, kw, kb = jax.random.split(key, 3)
        bound = 1.0 / jnp.sqrt(float(ins))
        w = jax.random.uniform(kw, (outs, ins), jnp.float32, -bound, bound)
        b = jax.random.uniform(kb, (outs,), jnp.float32, -bound, bound)
        params.append((w, b))
    return params


def mlp_forward_ref(x, params):
    """Pure-JAX reference for correctness checking (PyTorch layout)."""
    last = len(params) - 1
    h = x
    z = h
    for i, (w, b) in enumerate(params):
        z = h @ w.T + b
        if i < last:
            h = jnp.where(z >= 0.0, z, 0.01 * z)
    return z


if __name__ == "__main__":
    # Shapes consistent with the module:  shape=[32, 64, 48, 10]
    # → Linear(32,64) → leaky_relu → Linear(64,48) → leaky_relu → Linear(48,10)
    shape = [32, 64, 48, 10]
    batch = 8

    key = jax.random.PRNGKey(0)
    key, kx = jax.random.split(key)
    x = jax.random.normal(kx, (batch, shape[0]), jnp.float32)
    params = init_params(shape, key)

    padded_flat = prepare_params(params)          # one-time transpose + pad

    # 1) Small-batch latency path: single grid step, unpadded in/out.
    out = jax.block_until_ready(mlp_forward_pallas(x, padded_flat, shape[-1], None))
    ref = mlp_forward_ref(x, params)
    assert out.shape == (batch, shape[-1])
    assert jnp.allclose(out, ref, atol=2e-5, rtol=2e-5), "mismatch vs reference (small path)"

    # 2) Tiled throughput path: multiple grid steps, batch padding, lane-dense
    #    padded output + final slice (forced via a small bt_override to keep
    #    the test shapes small).
    batch2 = 40
    key, kx2 = jax.random.split(key)
    x2 = jax.random.normal(kx2, (batch2, shape[0]), jnp.float32)
    out2 = jax.block_until_ready(mlp_forward_pallas(x2, padded_flat, shape[-1], 16))
    ref2 = mlp_forward_ref(x2, params)
    assert out2.shape == (batch2, shape[-1])
    assert jnp.allclose(out2, ref2, atol=2e-5, rtol=2e-5), "mismatch vs reference (tiled path)"

    # TODO(synk): step()/open_lesson()/close_lesson() (SGD update, EWC/Fisher
    # accumulation) are training-time methods, not part of forward(), and are
    # not implemented.
    print("KERNEL_OK")
</pallas_src>

<mosaic_0001>
module attributes {stable_mosaic.version = 11 : i64} {
  func.func @_fused_mlp_kernel(%arg0: i32, %arg1: memref<8x32xf32, #tpu.memory_space<vmem>>, %arg2: memref<32x128xf32, #tpu.memory_space<vmem>>, %arg3: memref<1x128xf32, #tpu.memory_space<vmem>>, %arg4: memref<128x128xf32, #tpu.memory_space<vmem>>, %arg5: memref<1x128xf32, #tpu.memory_space<vmem>>, %arg6: memref<128x128xf32, #tpu.memory_space<vmem>>, %arg7: memref<1x128xf32, #tpu.memory_space<vmem>>, %arg8: memref<8x10xf32, #tpu.memory_space<vmem>>, %arg9: memref<8x128xf32, #tpu.memory_space<vmem>>) attributes {dimension_semantics = [#tpu.dimension_semantics<parallel>], iteration_bounds = array<i64: 1>, scalar_prefetch = 0 : i64, scratch_operands = 1 : i64, tpu.core_type = #tpu.core_type<tc>, window_params = [{pipeline_mode = #tpu.pipeline_mode<synchronous>, transform_indices = @transform_0, window_bounds = array<i64: 8, 32>}, {pipeline_mode = #tpu.pipeline_mode<synchronous>, transform_indices = @transform_1, window_bounds = array<i64: 32, 128>}, {pipeline_mode = #tpu.pipeline_mode<synchronous>, transform_indices = @transform_2, window_bounds = array<i64: 1, 128>}, {pipeline_mode = #tpu.pipeline_mode<synchronous>, transform_indices = @transform_3, window_bounds = array<i64: 128, 128>}, {pipeline_mode = #tpu.pipeline_mode<synchronous>, transform_indices = @transform_4, window_bounds = array<i64: 1, 128>}, {pipeline_mode = #tpu.pipeline_mode<synchronous>, transform_indices = @transform_5, window_bounds = array<i64: 128, 128>}, {pipeline_mode = #tpu.pipeline_mode<synchronous>, transform_indices = @transform_6, window_bounds = array<i64: 1, 128>}, {pipeline_mode = #tpu.pipeline_mode<synchronous>, transform_indices = @transform_7, window_bounds = array<i64: 8, 10>}]} {
    %c0 = arith.constant 0 : index
    %c0_0 = arith.constant 0 : index
    %0 = vector.load %arg1[%c0, %c0_0] : memref<8x32xf32, #tpu.memory_space<vmem>>, vector<8x32xf32>
    %c0_1 = arith.constant 0 : index
    %c0_2 = arith.constant 0 : index
    %1 = vector.load %arg2[%c0_1, %c0_2] : memref<32x128xf32, #tpu.memory_space<vmem>>, vector<32x128xf32>
    %c0_3 = arith.constant 0 : index
    %c0_4 = arith.constant 0 : index
    %2 = vector.load %arg3[%c0_3, %c0_4] : memref<1x128xf32, #tpu.memory_space<vmem>>, vector<1x128xf32>
    %cst = arith.constant dense<0.000000e+00> : vector<8x128xf32>
    %3 = tpu.matmul %0, %1, %cst {dimension_numbers = #tpu.dot_dimension_numbers<[1], [0], [0], [1], [0, 0, 1, 1], [], []>} : vector<8x32xf32>, vector<32x128xf32>, vector<8x128xf32> -> vector<8x128xf32>
    %4 = vector.broadcast %2 : vector<1x128xf32> to vector<8x128xf32>
    %5 = arith.addf %3, %4 : vector<8x128xf32>
    %cst_5 = arith.constant 0.000000e+00 : f32
    %6 = vector.broadcast %cst_5 : f32 to vector<8x128xf32>
    %7 = arith.cmpf oge, %5, %6 : vector<8x128xf32>
    %cst_6 = arith.constant 0.00999999977 : f32
    %8 = vector.broadcast %cst_6 : f32 to vector<8x128xf32>
    %9 = arith.mulf %8, %5 : vector<8x128xf32>
    %10 = arith.select %7, %5, %9 : vector<8x128xi1>, vector<8x128xf32>
    %c0_7 = arith.constant 0 : index
    %c0_8 = arith.constant 0 : index
    %11 = vector.load %arg9[%c0_7, %c0_8] : memref<8x128xf32, #tpu.memory_space<vmem>>, vector<8x128xf32>
    tpu.vector_store %arg9[%c0_7, %c0_8], %10 {strides = array<i32>} : memref<8x128xf32, #tpu.memory_space<vmem>>, vector<8x128xf32>,
    %c0_9 = arith.constant 0 : index
    %c0_10 = arith.constant 0 : index
    %12 = vector.load %arg9[%c0_9, %c0_10] : memref<8x128xf32, #tpu.memory_space<vmem>>, vector<8x128xf32>
    %c0_11 = arith.constant 0 : index
    %c0_12 = arith.constant 0 : index
    %13 = vector.load %arg4[%c0_11, %c0_12] : memref<128x128xf32, #tpu.memory_space<vmem>>, vector<128x128xf32>
    %c0_13 = arith.constant 0 : index
    %c0_14 = arith.constant 0 : index
    %14 = vector.load %arg5[%c0_13, %c0_14] : memref<1x128xf32, #tpu.memory_space<vmem>>, vector<1x128xf32>
    %cst_15 = arith.constant dense<0.000000e+00> : vector<8x128xf32>
    %15 = tpu.matmul %12, %13, %cst_15 {dimension_numbers = #tpu.dot_dimension_numbers<[1], [0], [0], [1], [0, 0, 1, 1], [], []>} : vector<8x128xf32>, vector<128x128xf32>, vector<8x128xf32> -> vector<8x128xf32>
    %16 = vector.broadcast %14 : vector<1x128xf32> to vector<8x128xf32>
    %17 = arith.addf %15, %16 : vector<8x128xf32>
    %cst_16 = arith.constant 0.000000e+00 : f32
    %18 = vector.broadcast %cst_16 : f32 to vector<8x128xf32>
    %19 = arith.cmpf oge, %17, %18 : vector<8x128xf32>
    %cst_17 = arith.constant 0.00999999977 : f32
    %20 = vector.broadcast %cst_17 : f32 to vector<8x128xf32>
    %21 = arith.mulf %20, %17 : vector<8x128xf32>
    %22 = arith.select %19, %17, %21 : vector<8x128xi1>, vector<8x128xf32>
    %c0_18 = arith.constant 0 : index
    %c0_19 = arith.constant 0 : index
    %23 = vector.load %arg9[%c0_18, %c0_19] : memref<8x128xf32, #tpu.memory_space<vmem>>, vector<8x128xf32>
    tpu.vector_store %arg9[%c0_18, %c0_19], %22 {strides = array<i32>} : memref<8x128xf32, #tpu.memory_space<vmem>>, vector<8x128xf32>,
    %c0_20 = arith.constant 0 : index
    %c0_21 = arith.constant 0 : index
    %24 = vector.load %arg9[%c0_20, %c0_21] : memref<8x128xf32, #tpu.memory_space<vmem>>, vector<8x128xf32>
    %c0_22 = arith.constant 0 : index
    %c0_23 = arith.constant 0 : index
    %25 = vector.load %arg6[%c0_22, %c0_23] : memref<128x128xf32, #tpu.memory_space<vmem>>, vector<128x128xf32>
    %c0_24 = arith.constant 0 : index
    %c0_25 = arith.constant 0 : index
    %26 = vector.load %arg7[%c0_24, %c0_25] : memref<1x128xf32, #tpu.memory_space<vmem>>, vector<1x128xf32>
    %cst_26 = arith.constant dense<0.000000e+00> : vector<8x128xf32>
    %27 = tpu.matmul %24, %25, %cst_26 {dimension_numbers = #tpu.dot_dimension_numbers<[1], [0], [0], [1], [0, 0, 1, 1], [], []>} : vector<8x128xf32>, vector<128x128xf32>, vector<8x128xf32> -> vector<8x128xf32>
    %28 = vector.broadcast %26 : vector<1x128xf32> to vector<8x128xf32>
    %29 = arith.addf %27, %28 : vector<8x128xf32>
    %30 = vector.extract_strided_slice %29 {offsets = [0, 0], sizes = [8, 10], strides = [1, 1]} : vector<8x128xf32> to vector<8x10xf32>
    %c0_27 = arith.constant 0 : index
    %c0_28 = arith.constant 0 : index
    %31 = vector.load %arg8[%c0_27, %c0_28] : memref<8x10xf32, #tpu.memory_space<vmem>>, vector<8x10xf32>
    tpu.vector_store %arg8[%c0_27, %c0_28], %30 {strides = array<i32>} : memref<8x10xf32, #tpu.memory_space<vmem>>, vector<8x10xf32>,
    return
  }
  func.func @transform_0(%arg0: i32) -> (i32, i32) {
    %c0_i32 = arith.constant 0 : i32
    %c0_i32_0 = arith.constant 0 : i32
    %c0_i32_1 = arith.constant 0 : i32
    return %c0_i32, %c0_i32_0 : i32, i32
  }
  func.func @transform_1(%arg0: i32) -> (i32, i32) {
    %c0_i32 = arith.constant 0 : i32
    %c0_i32_0 = arith.constant 0 : i32
    %c0_i32_1 = arith.constant 0 : i32
    return %c0_i32, %c0_i32_0 : i32, i32
  }
  func.func @transform_2(%arg0: i32) -> (i32, i32) {
    %c0_i32 = arith.constant 0 : i32
    %c0_i32_0 = arith.constant 0 : i32
    %c0_i32_1 = arith.constant 0 : i32
    return %c0_i32, %c0_i32_0 : i32, i32
  }
  func.func @transform_3(%arg0: i32) -> (i32, i32) {
    %c0_i32 = arith.constant 0 : i32
    %c0_i32_0 = arith.constant 0 : i32
    %c0_i32_1 = arith.constant 0 : i32
    return %c0_i32, %c0_i32_0 : i32, i32
  }
  func.func @transform_4(%arg0: i32) -> (i32, i32) {
    %c0_i32 = arith.constant 0 : i32
    %c0_i32_0 = arith.constant 0 : i32
    %c0_i32_1 = arith.constant 0 : i32
    return %c0_i32, %c0_i32_0 : i32, i32
  }
  func.func @transform_5(%arg0: i32) -> (i32, i32) {
    %c0_i32 = arith.constant 0 : i32
    %c0_i32_0 = arith.constant 0 : i32
    %c0_i32_1 = arith.constant 0 : i32
    return %c0_i32, %c0_i32_0 : i32, i32
  }
  func.func @transform_6(%arg0: i32) -> (i32, i32) {
    %c0_i32 = arith.constant 0 : i32
    %c0_i32_0 = arith.constant 0 : i32
    %c0_i32_1 = arith.constant 0 : i32
    return %c0_i32, %c0_i32_0 : i32, i32
  }
  func.func @transform_7(%arg0: i32) -> (i32, i32) {
    %c0_i32 = arith.constant 0 : i32
    %c0_i32_0 = arith.constant 0 : i32
    %c0_i32_1 = arith.constant 0 : i32
    return %c0_i32, %c0_i32_0 : i32, i32
  }
}

</mosaic_0001>

<bundles_post_ra>
// kernel: mlp_forward_pallas.1
= control target key start
LH: loop header
LB: loop body
LE: loop exit
PB: predicated region body
PF: predicated region fallthrough
CT: control target
= control target key end

     0   :  { %12 = vsyncpa [#allocation4], 0  ;;  %s836_s0 = inlined_call_operand.hbm [shape: f32[8,32], index: 0, kind: input, shape index: {}]   ;;  %s837_s1 = inlined_call_operand.hbm [shape: f32[32,128], index: 1, kind: input, shape index: {}]   ;;  %s838_s2 = inlined_call_operand.vmem [shape: f32[1,128], index: 2, kind: input, shape index: {}]   ;;  %s839_s3 = inlined_call_operand.hbm [shape: f32[128,128], index: 3, kind: input, shape index: {}]   ;;  %s840_s4 = inlined_call_operand.vmem [shape: f32[1,128], index: 4, kind: input, shape index: {}]   ;;  %s841_s5 = inlined_call_operand.hbm [shape: f32[128,128], index: 5, kind: input, shape index: {}]   ;;  %s842_s6 = inlined_call_operand.vmem [shape: f32[1,128], index: 6, kind: input, shape index: {}]   ;;  %s843_s7 = inlined_call_operand.hbm [shape: f32[8,10], index: 7, kind: output, shape index: {}]  }
   0x1   :  { %13 = vsyncpa [#allocation7], 0 }
   0x2   :  { %14 = vsyncpa [#allocation10], 0 }
   0x3   :  { %15 = vsyncpa [#allocation5], 0  ;;  %s687_s24 = smov [#allocation6]   ;;  %s569_s28 = scalar_lea.hbm %s837_s1, 512 }
   0x4   :  { %s31_s25 = sshll.u32 %s687_s24, 4  ;;  %p570_p0 = scmp.ne.s32.totalorder %s837_s1, %s569_s28  ;;  %s32_s25 = int_to_ptr.vmem [resolvable:$true] %s31_s25 }
   0x5   :  { %p573_p1 = scmp.lt.u32.totalorder %s569_s28, %s837_s1 }
   0x7   :  { %p575_p2 = pnand %p573_p1, %p570_p0 }
   0x9   :  { %578 = shalt.err (!%p575_p2)
}
   0xa   :  { %s579_s10 = scalar_lea.vmem %s32_s25, 512  ;;  %p584_p4 = scmp.lt.s32.totalorder %s32_s25, %s32_s25 }
   0xb   :  { %p580_p3 = scmp.ne.s32.totalorder %s32_s25, %s579_s10  ;;  %p585_p5 = scmp.lt.s32.totalorder %s579_s10, %s579_s10 }
   0xd   :  { %p586_p6 = por %p585_p5, %p584_p4 }
   0xf   :  { %p587_p7 = pnand %p586_p6, %p580_p3 }
  0x11   :  { %590 = shalt.err (!%p587_p7)
}
  0x12   :  { %s688_s11 = smov 128   ;;  %s689_s12 = smov 8  }
  0x13   :  { %37 = dma.hbm_to_vmem [thread:$0]  %s837_s1, 512, %s32_s25, [#allocation7], %s688_s11, %s688_s11, %s689_s12  }
  0x14   :  { %s690_s15 = smov [#allocation3]   ;;  %s691_s17 = smov [#allocation8]  }
  0x15   :  { %s22_s16 = sshll.u32 %s690_s15, 4  ;;  %s45_s18 = sshll.u32 %s691_s17, 4  ;;  %s23_s16 = int_to_ptr.vmem [resolvable:$true] %s22_s16  ;;  %s46_s18 = int_to_ptr.vmem [resolvable:$true] %s45_s18 }
  0x16   :  { %s591_s21 = scalar_lea.hbm %s836_s0, 128 }
  0x17   :  { %p592_p8 = scmp.ne.s32.totalorder %s836_s0, %s591_s21  ;;  %p595_p9 = scmp.lt.u32.totalorder %s591_s21, %s836_s0 }
  0x19   :  { %p597_p10 = pnand %p595_p9, %p592_p8 }
  0x1b   :  { %600 = shalt.err (!%p597_p10)
}
  0x1c   :  { %s601_s1 = scalar_lea.vmem %s23_s16, 128  ;;  %p606_p12 = scmp.lt.s32.totalorder %s23_s16, %s23_s16 }
  0x1d   :  { %p602_p11 = scmp.ne.s32.totalorder %s23_s16, %s601_s1  ;;  %p607_p13 = scmp.lt.s32.totalorder %s601_s1, %s601_s1 }
  0x1f   :  { %p608_p0 = por %p607_p13, %p606_p12 }
  0x21   :  { %p609_p1 = pnand %p608_p0, %p602_p11 }
  0x23   :  { %612 = shalt.err (!%p609_p1)
}
  0x24   :  { %25 = dma.hbm_to_vmem [thread:$0]  %s836_s0, 128, %s23_s16, [#allocation4]  }
  0x25   :  { %s613_s30 = scalar_lea.hbm %s839_s3, 2048 }
  0x26   :  { %p614_p2 = scmp.ne.s32.totalorder %s839_s3, %s613_s30  ;;  %p617_p3 = scmp.lt.u32.totalorder %s613_s30, %s839_s3 }
  0x28   :  { %p619_p4 = pnand %p617_p3, %p614_p2 }
  0x2a   :  { %622 = shalt.err (!%p619_p4)
}
  0x2b   :  { %s623_s14 = scalar_lea.vmem %s46_s18, 2048  ;;  %p628_p6 = scmp.lt.s32.totalorder %s46_s18, %s46_s18 }
  0x2c   :  { %p624_p5 = scmp.ne.s32.totalorder %s46_s18, %s623_s14  ;;  %p629_p7 = scmp.lt.s32.totalorder %s623_s14, %s623_s14 }
  0x2e   :  { %p630_p8 = por %p629_p7, %p628_p6 }
  0x30   :  { %p631_p9 = pnand %p630_p8, %p624_p5 }
  0x32   :  { %634 = shalt.err (!%p631_p9)
}
  0x33   :  { %51 = dma.hbm_to_vmem [thread:$0]  %s839_s3, 2048, %s46_s18, [#allocation7], %s688_s11, %s688_s11, %s689_s12  }
  0x34   :  { %s692_s16 = smov [#allocation9]   ;;  %s635_s21 = scalar_lea.hbm %s841_s5, 2048 }
  0x35   :  { %s59_s17 = sshll.u32 %s692_s16, 4  ;;  %p636_p10 = scmp.ne.s32.totalorder %s841_s5, %s635_s21  ;;  %s60_s17 = int_to_ptr.vmem [resolvable:$true] %s59_s17 }
  0x36   :  { %p639_p11 = scmp.lt.u32.totalorder %s635_s21, %s841_s5 }
  0x38   :  { %p641_p12 = pnand %p639_p11, %p636_p10 }
  0x3a   :  { %644 = shalt.err (!%p641_p12)
}
  0x3b   :  { %s645_s1 = scalar_lea.vmem %s60_s17, 2048  ;;  %p650_p0 = scmp.lt.s32.totalorder %s60_s17, %s60_s17 }
  0x3c   :  { %p646_p13 = scmp.ne.s32.totalorder %s60_s17, %s645_s1  ;;  %p651_p1 = scmp.lt.s32.totalorder %s645_s1, %s645_s1 }
  0x3e   :  { %p652_p2 = por %p651_p1, %p650_p0 }
  0x40   :  { %p653_p3 = pnand %p652_p2, %p646_p13 }
  0x42   :  { %656 = shalt.err (!%p653_p3)
}
  0x43   :  { %65 = dma.hbm_to_vmem [thread:$0]  %s841_s5, 2048, %s60_s17, [#allocation10], %s688_s11, %s688_s11, %s689_s12  }
  0x44   :  { %679 = dma.done.wait [#allocation4], 128  }
  0x45   :  { %680 = vsyncadd [#allocation4], 4294967168 }
  0x46   :  { %681 = dma.done.wait [#allocation7], 2560  }
  0x47   :  { %682 = vsyncadd [#allocation7], 4294964736 }
  0x48   :  { %683 = dma.done.wait [#allocation10], 2048  }
  0x49   :  { %684 = vsyncadd [#allocation10], 4294965248  ;;  %v693_v0 = vmov 0.0|0.0   ;;  %vm694_vm0 = vmmov 0   ;;  %v695_v1 = vmov 0.0   ;;  %v81_v2 = vld [vmem:[#allocation6] sm:$0xff] }
  0x4a   :  { %505 = vmatprep.subr.bf16.mxu0 %v693_v0  ;;  %432 = vmatprep.mubr.msk.f32.mxu0 %vm694_vm0, %v695_v1  ;;  %v82_v3 = vld [vmem:[#allocation6 + $0x8] sm:$0xff]  ;;  %v83_v4 = vld [vmem:[#allocation6 + $0x10] sm:$0xff]  ;;  %v84_v6 = vld [vmem:[#allocation6 + $0x18] sm:$0xff]  ;;  %vm92_vm1 = vcmask 261120   ;;  %s696_s28 = smov [#allocation11]   ;;  %vm362_vm4 = vcmask 80896  }
  0x4b   :  { %511 = vmatprep.subr.bf16.mxu1 %v693_v0  ;;  %467 = vmatprep.mubr.msk.f32.mxu1 %vm694_vm0, %v695_v1  ;;  %v506_v5 = vpack.c.bf16 %v82_v3, %v81_v2  ;;  %v171_v7 = vld [vmem:[#allocation8] sm:$0xff]  ;;  %v172_v8 = vld [vmem:[#allocation8 + $0x8] sm:$0xff]  ;;  %v173_v9 = vld [vmem:[#allocation8 + $0x10] sm:$0xff]  ;;  %v509_v11 = vpack.c.bf16 %v84_v6, %v83_v4  ;;  %s370_s29 = sshll.u32 %s696_s28, 4  ;;  %s371_s29 = int_to_ptr.vmem [resolvable:$true] %s370_s29 }
  0x4c   :  { %v174_v10 = vld [vmem:[#allocation8 + $0x18] sm:$0xff]  ;;  %v512_v12 = vpack.c.bf16 %v172_v8, %v171_v7  ;;  %v175_v14 = vld [vmem:[#allocation8 + $0x20] sm:$0xff]  ;;  %v176_v15 = vld [vmem:[#allocation8 + $0x28] sm:$0xff]  ;;  %p662_p5 = scmp.lt.s32.totalorder %s371_s29, %s371_s29 }
  0x4d   :  { %507 = vmatpush3.bf16.msra.mxu0 %v506_v5  ;;  %v515_v13 = vpack.c.bf16 %v174_v10, %v173_v9  ;;  %v80_v16 = vld [vmem:[#allocation3] sm:$0xff]  ;;  %v518_v17 = vpack.c.bf16 %v176_v15, %v175_v14  ;;  %v177_v18 = vld [vmem:[#allocation8 + $0x30] sm:$0xff]  ;;  %v179_v21 = vld [vmem:[#allocation8 + $0x40] sm:$0xff] }
  0x4e   :  { %508 = vmatprep.subr.bf16.mxu0 %v693_v0  ;;  %513 = vmatpush3.bf16.msra.mxu1 %v512_v12  ;;  %v178_v19 = vld [vmem:[#allocation8 + $0x38] sm:$0xff]  ;;  %v180_v22 = vld [vmem:[#allocation8 + $0x48] sm:$0xff]  ;;  %v181_v24 = vld [vmem:[#allocation8 + $0x50] sm:$0xff] }
  0x4f   :  { %514 = vmatprep.subr.bf16.mxu1 %v693_v0  ;;  %v521_v20 = vpack.c.bf16 %v178_v19, %v177_v18  ;;  %v524_v23 = vpack.c.bf16 %v180_v22, %v179_v21  ;;  %v182_v25 = vld [vmem:[#allocation8 + $0x58] sm:$0xff]  ;;  %v183_v27 = vld [vmem:[#allocation8 + $0x60] sm:$0xff]  ;;  %v184_v28 = vld [vmem:[#allocation8 + $0x68] sm:$0xff] }
  0x50   :  { %v527_v26 = vpack.c.bf16 %v182_v25, %v181_v24  ;;  %v530_v29 = vpack.c.bf16 %v184_v28, %v183_v27  ;;  %v185_v30 = vld [vmem:[#allocation8 + $0x70] sm:$0xff]  ;;  %v186_v31 = vld [vmem:[#allocation8 + $0x78] sm:$0xff]  ;;  %v269_v33 = vld [vmem:[#allocation9] sm:$0xff] }
  0x51   :  { %510 = vmatpush3.bf16.msra.mxu0 %v509_v11  ;;  %v533_v32 = vpack.c.bf16 %v186_v31, %v185_v30  ;;  %v270_v34 = vld [vmem:[#allocation9 + $0x8] sm:$0xff]  ;;  %v271_v35 = vld [vmem:[#allocation9 + $0x10] sm:$0xff]  ;;  %v272_v37 = vld [vmem:[#allocation9 + $0x18] sm:$0xff] }
  0x52   :  { %535 = vmatprep.subr.bf16.mxu0 %v693_v0  ;;  %516 = vmatpush3.bf16.msra.mxu1 %v515_v13  ;;  %v536_v36 = vpack.c.bf16 %v270_v34, %v269_v33  ;;  %v539_v38 = vpack.c.bf16 %v272_v37, %v271_v35  ;;  %v273_v39 = vld [vmem:[#allocation9 + $0x20] sm:$0xff]  ;;  %v274_v40 = vld [vmem:[#allocation9 + $0x28] sm:$0xff]  ;;  %v275_v42 = vld [vmem:[#allocation9 + $0x30] sm:$0xff] }
  0x53   :  { %517 = vmatprep.subr.bf16.mxu1 %v693_v0  ;;  %v542_v41 = vpack.c.bf16 %v274_v40, %v273_v39  ;;  %v276_v43 = vld [vmem:[#allocation9 + $0x38] sm:$0xff]  ;;  %v277_v45 = vld [vmem:[#allocation9 + $0x40] sm:$0xff]  ;;  %v278_v46 = vld [vmem:[#allocation9 + $0x48] sm:$0xff] }
  0x54   :  { %433 = vmatmul.mubr.msk.f32.vlgmr.msra.gmra.mrb[0].mxu0 %vm92_vm1, %v80_v16  ;;  %v545_v44 = vpack.c.bf16 %v276_v43, %v275_v42  ;;  %v548_v47 = vpack.c.bf16 %v278_v46, %v277_v45  ;;  %v279_v48 = vld [vmem:[#allocation9 + $0x50] sm:$0xff]  ;;  %v280_v49 = vld [vmem:[#allocation9 + $0x58] sm:$0xff]  ;;  %v281_v51 = vld [vmem:[#allocation9 + $0x60] sm:$0xff] }
  0x55   :  { %502 = vmatprep.mubr.msk.f32.mxu0 %vm694_vm0, %v695_v1  ;;  %537 = vmatpush3.bf16.msra.mxu0 %v536_v36  ;;  %v551_v50 = vpack.c.bf16 %v280_v49, %v279_v48  ;;  %v282_v52 = vld [vmem:[#allocation9 + $0x68] sm:$0xff]  ;;  %v381_v54 = vld [vmem:[%s838_s2] ss:$0 sm:$0xff]  ;;  %v283_v60 = vld [vmem:[#allocation9 + $0x70] sm:$0xff] }
  0x56   :  { %519 = vmatpush3.bf16.msra.mxu1 %v518_v17  ;;  %538 = vmatprep.subr.bf16.mxu0 %v693_v0  ;;  %v554_v53 = vpack.c.bf16 %v282_v52, %v281_v51  ;;  %v284_v61 = vld [vmem:[#allocation9 + $0x78] sm:$0xff] }
  0x57   :  { %520 = vmatprep.subr.bf16.mxu1 %v693_v0  ;;  %v557_v62 = vpack.c.bf16 %v284_v61, %v283_v60  ;;  %v383_v63 = vld [vmem:[%s840_s4] ss:$0 sm:$0xff]  ;;  %s657_s4 = scalar_lea.vmem %s371_s29, 128 }
  0x58   :  { %v384_v5 = vld [vmem:[%s842_s6] ss:$0 sm:$0xff]  ;;  %p658_p4 = scmp.ne.s32.totalorder %s371_s29, %s657_s4  ;;  %p663_p6 = scmp.lt.s32.totalorder %s657_s4, %s657_s4 }
  0x59   :  { %540 = vmatpush3.bf16.msra.mxu0 %v539_v38 }
  0x5a   :  { %522 = vmatpush3.bf16.msra.mxu1 %v521_v20  ;;  %541 = vmatprep.subr.bf16.mxu0 %v693_v0  ;;  %p664_p7 = por %p663_p6, %p662_p5 }
  0x5b   :  { %523 = vmatprep.subr.bf16.mxu1 %v693_v0 }
  0x5c   :  { %p665_p8 = pnand %p664_p7, %p658_p4 }
  0x5d   :  { %543 = vmatpush3.bf16.msra.mxu0 %v542_v41 }
  0x5e   :  { %525 = vmatpush3.bf16.msra.mxu1 %v524_v23  ;;  %544 = vmatprep.subr.bf16.mxu0 %v693_v0 }
  0x5f   :  { %526 = vmatprep.subr.bf16.mxu1 %v693_v0 }
  0x61   :  { %546 = vmatpush3.bf16.msra.mxu0 %v545_v44 }
  0x62   :  { %528 = vmatpush3.bf16.msra.mxu1 %v527_v26  ;;  %547 = vmatprep.subr.bf16.mxu0 %v693_v0 }
  0x63   :  { %529 = vmatprep.subr.bf16.mxu1 %v693_v0 }
  0x65   :  { %549 = vmatpush3.bf16.msra.mxu0 %v548_v47 }
  0x66   :  { %531 = vmatpush3.bf16.msra.mxu1 %v530_v29  ;;  %550 = vmatprep.subr.bf16.mxu0 %v693_v0 }
  0x67   :  { %532 = vmatprep.subr.bf16.mxu1 %v693_v0 }
  0x69   :  { %552 = vmatpush3.bf16.msra.mxu0 %v551_v50 }
  0x6a   :  { %534 = vmatpush3.bf16.msra.mxu1 %v533_v32  ;;  %553 = vmatprep.subr.bf16.mxu0 %v693_v0 }
  0x6d   :  { %555 = vmatpush3.bf16.msra.mxu0 %v554_v53 }
  0x6e   :  { %556 = vmatprep.subr.bf16.mxu0 %v693_v0 }
  0x71   :  { %558 = vmatpush3.bf16.msra.mxu0 %v557_v62 }
 0x127   :  { %v162_v55 = vpop.f32.mrb[0].mxu0 }
 0x128   :  { %v163_v56 = vadd.f32 %v381_v54, %v162_v55  ;;  %v434_v57 = vpop.f32.mrb[1].mxu0 }
 0x12a   :  { %v167_v58 = vmul.f32 0.01, %v163_v56  ;;  %vm166_vm2 = vcmp.ge.f32.partialorder %v163_v56, 0.0 }
 0x12c   :  { %v168_v59 = vsel %vm166_vm2, %v163_v56, %v167_v58 }
 0x12d   :  { %468 = vmatmul.mubr.f32.vlgmr.msra.gmra.mrb[0].mxu1 %v168_v59 }
 0x200   :  { %v260_v0 = vpop.f32.mrb[0].mxu1 }
 0x201   :  { %v261_v1 = vadd.f32 %v383_v63, %v260_v0  ;;  %v469_v2 = vpop.f32.mrb[1].mxu1 }
 0x203   :  { %vm264_vm3 = vcmp.ge.f32.partialorder %v261_v1, 0.0  ;;  %v265_v3 = vmul.f32 0.01, %v261_v1 }
 0x205   :  { %v266_v4 = vsel %vm264_vm3, %v261_v1, %v265_v3 }
 0x206   :  { %503 = vmatmul.mubr.f32.vlgmr.msra.gmra.mrb[2].mxu0 %v266_v4 }
 0x2d9   :  { %v358_v6 = vpop.f32.mrb[2].mxu0 }
 0x2da   :  { %v359_v7 = vadd.f32 %v384_v5, %v358_v6  ;;  %v504_v8 = vpop.f32.mrb[3].mxu0 }
 0x2dc   :  { %363 = vst.msk [vmem:[#allocation11] sm:$0xff] %vm362_vm4, %v359_v7 }
 0x2dd   :  { %668 = shalt.err (!%p665_p8)
}
 0x2de   :  { %s669_s9 = scalar_lea.hbm %s843_s7, 128 }
 0x2df   :  { %p670_p9 = scmp.ne.s32.totalorder %s843_s7, %s669_s9  ;;  %p673_p10 = scmp.lt.u32.totalorder %s669_s9, %s843_s7 }
 0x2e1   :  { %p675_p11 = pnand %p673_p10, %p670_p9 }
 0x2e3   :  { %678 = shalt.err (!%p675_p11)
}
 0x2e4   :  { %373 = dma.vmem_to_hbm [thread:$0]  %s371_s29, 128, %s843_s7, [#allocation5]  }
 0x2e5   :  { %685 = dma.done.wait [#allocation5], 128  }
 0x2e6   :  { %686 = vsyncadd [#allocation5], 4294967168 }
 0x2e7   :  { %377 = vsyncpa [#allocation4], 1 }
 0x2e8   :  { %378 = vsyncpa [#allocation7], 1 }
 0x2e9   :  { %379 = vsyncpa [#allocation10], 1 }
 0x2ea   :  { %380 = vsyncpa [#allocation5], 1 }

</bundles_post_ra>
